<compile_context>
chip_gen: v7x
topology: tpu7x:2x2x1
jax: 0.10.0
libtpu: 0.0.40
codegen_flags: <defaults>
</compile_context>

<pallas_src>
import jax
import jax.numpy as jnp
from jax.experimental import pallas as pl
from jax.experimental.pallas import tpu as pltpu

# ---- stand-ins for FLAGS (small, deterministic) -----------------------------
OBJ_C = 6
DIM_FUSE = 128 + 128 + 256 + 256 + 512 + OBJ_C     # 1286, hard-coded sum in module
DIM_FUSE_PAD = 1408                                # next multiple of 128 (lane-aligned K)
C_PF = 128                                         # channels of ptv2 per-point feature
FEAT_FACE = C_PF + 256                             # FLAGS.feat_face (face_head cin = feat_face + 3)
RECON_NUM = 3
FACE_RECON_C = 30                                  # FLAGS.face_recon_c
OUT_PAD = 128                                      # lane-dense output slab width
EPS = 1e-5
TN = 256                                           # point-tile size


# ---------------------------------------------------------------------------
# Kernel 1: f_global = max over points of point_feat   (fm_4.max(1)[0])
# Accumulate into a VMEM scratch; write the (1, C) output only on the last
# grid step (avoids a sublane-1 output read-modify-write every iteration).
# ---------------------------------------------------------------------------
def max_reduce_kernel(x_ref, o_ref, acc_ref):
    tile_max = jnp.max(x_ref[...], axis=0, keepdims=True)

    @pl.when(pl.program_id(0) == 0)
    def _():
        acc_ref[...] = tile_max

    @pl.when(pl.program_id(0) > 0)
    def _():
        acc_ref[...] = jnp.maximum(acc_ref[...], tile_max)

    @pl.when(pl.program_id(0) == pl.num_programs(0) - 1)
    def _():
        o_ref[...] = acc_ref[...]


def global_max(point_feat):
    n, c = point_feat.shape
    return pl.pallas_call(
        max_reduce_kernel,
        out_shape=jax.ShapeDtypeStruct((1, c), jnp.float32),
        grid_spec=pltpu.PrefetchScalarGridSpec(
            num_scalar_prefetch=0,
            grid=(n // TN,),
            in_specs=[pl.BlockSpec((TN, c), lambda i: (i, 0))],
            out_specs=pl.BlockSpec((1, c), lambda i: (0, 0)),
            scratch_shapes=[pltpu.VMEM((1, c), jnp.float32)],
        ),
        compiler_params=pltpu.CompilerParams(dimension_semantics=("arbitrary",)),
    )(point_feat)


# ---------------------------------------------------------------------------
# Kernel 2: fused conv1d_block + recon_head + face_head
#   conv1d_block : (dim_fuse->512 BN ReLU)(512->512 BN ReLU)(512->256 BN ReLU)
#   recon_head   : (256->128 BN ReLU)(128->3)
#   face_head    : input = concat[f_global bcast | conv1d_out | vertices]
#                  (387->512 BN ReLU)(512->256 BN ReLU)(256->128 BN ReLU)(128->face_c)
# The face_head first conv weight is split into 3 row-blocks: the f_global
# block is pre-folded into the bias (bf1e) outside the kernel, the vertices
# block (K=3) runs as VPU broadcast multiply-adds, so no concat and no tiny
# MXU passes are needed inside the kernel.  The final 128->3 and 128->30
# projections write into a single lane-dense (TN, 128) output slab.
# ---------------------------------------------------------------------------
def fused_heads_kernel(
    feat_ref, verts_ref,
    w1, b1, w2, b2, w3, b3,
    wr1, br1,
    wf1b, wf1c, bf1e,
    wf2, bf2, wf3, bf3,
    wout_r, wout_f, bout,
    out_ref,
):
    bf16 = jnp.bfloat16
    dot = lambda a, b: jnp.dot(a, b, preferred_element_type=jnp.float32)
    relu = lambda x: jnp.maximum(x, 0.0)

    # conv1d_block (BN scale already folded into the weight columns)
    x = feat_ref[...]                                             # (TN, 1408) bf16
    h = relu(dot(x, w1[...]) + b1[...])                           # (TN, 512) f32
    h = relu(dot(h.astype(bf16), w2[...]) + b2[...])              # (TN, 512)
    conv_out = relu(dot(h.astype(bf16), w3[...]) + b3[...])       # (TN, 256)
    c16 = conv_out.astype(bf16)

    # recon head (its final 128->3 projection is merged into the output slab)
    r = relu(dot(c16, wr1[...]) + br1[...])                       # (TN, 128)

    # face head: f_global term pre-folded into bf1e, verts term on the VPU
    v = verts_ref[...]                                            # (TN, 3) f32
    wc = wf1c[...]                                                # (3, 512) f32
    f = dot(c16, wf1b[...]) + bf1e[...]
    f = f + v[:, 0:1] * wc[0:1, :] + v[:, 1:2] * wc[1:2, :] + v[:, 2:3] * wc[2:3, :]
    f = relu(f)                                                   # (TN, 512)
    f = relu(dot(f.astype(bf16), wf2[...]) + bf2[...])            # (TN, 256)
    f = relu(dot(f.astype(bf16), wf3[...]) + bf3[...])            # (TN, 128)

    # single lane-dense output slab: recon -> cols [0,3), face -> cols [3,33)
    out_ref[...] = (dot(r.astype(bf16), wout_r[...])
                    + dot(f.astype(bf16), wout_f[...])
                    + bout[...])


def run_heads(feat_pad, verts, ops):
    n = feat_pad.shape[0]
    weight_specs = [pl.BlockSpec(op.shape, lambda i: (0, 0)) for op in ops]
    in_specs = ([pl.BlockSpec((TN, DIM_FUSE_PAD), lambda i: (i, 0)),
                 pl.BlockSpec((TN, 3), lambda i: (i, 0))]
                + weight_specs)
    out_specs = pl.BlockSpec((TN, OUT_PAD), lambda i: (i, 0))

    flops_pt = 2 * (DIM_FUSE_PAD * 512 + 512 * 512 + 512 * 256
                    + 256 * 128 + 256 * 512 + 512 * 256 + 256 * 128
                    + 2 * 128 * OUT_PAD)
    w_bytes = sum(int(op.size) * op.dtype.itemsize for op in ops)
    cost = pl.CostEstimate(
        flops=n * flops_pt,
        transcendentals=0,
        bytes_accessed=n * (DIM_FUSE_PAD * 2 + 3 * 4 + OUT_PAD * 4) + w_bytes,
    )

    return pl.pallas_call(
        fused_heads_kernel,
        out_shape=jax.ShapeDtypeStruct((n, OUT_PAD), jnp.float32),
        grid_spec=pltpu.PrefetchScalarGridSpec(
            num_scalar_prefetch=0,
            grid=(n // TN,),
            in_specs=in_specs,
            out_specs=out_specs,
        ),
        compiler_params=pltpu.CompilerParams(
            dimension_semantics=("parallel",),
            vmem_limit_bytes=48 << 20,   # below v7x's 64 MiB physical VMEM
        ),
        cost_estimate=cost,
    )(feat_pad, verts, *ops)


# ---------------------------------------------------------------------------
# Deterministic parameter construction (Conv1d(k=1) + folded eval-mode BN)
# ---------------------------------------------------------------------------
def conv_bn_params(key, cin, cout):
    kw, kb = jax.random.split(key)
    w = jax.random.normal(kw, (cin, cout), jnp.float32) * 0.02
    cb = jax.random.normal(kb, (cout,), jnp.float32) * 0.02
    gamma = jnp.ones((cout,), jnp.float32)
    beta = jnp.zeros((cout,), jnp.float32)
    mean = jnp.zeros((cout,), jnp.float32)
    var = jnp.ones((cout,), jnp.float32)
    scale = gamma / jnp.sqrt(var + EPS)
    w_folded = w * scale[None, :]                 # BN scale folded into weights
    bias = (cb - mean) * scale + beta
    return w_folded, bias.reshape(1, cout)


def conv_params(key, cin, cout):
    kw, kb = jax.random.split(key)
    w = jax.random.normal(kw, (cin, cout), jnp.float32) * 0.02
    b = jax.random.normal(kb, (cout,), jnp.float32) * 0.02
    return w, b.reshape(1, cout)


def build_params(key):
    ks = jax.random.split(key, 16)
    bf16 = jnp.bfloat16
    p = {}
    # ptv2 stub weights
    p["ptv2_wg"] = jax.random.normal(ks[0], (3, DIM_FUSE), jnp.float32) * 0.5
    p["ptv2_bg"] = jax.random.normal(ks[1], (DIM_FUSE,), jnp.float32) * 0.1
    p["ptv2_wp"] = jax.random.normal(ks[2], (3, C_PF), jnp.float32) * 0.5
    p["ptv2_bp"] = jax.random.normal(ks[3], (C_PF,), jnp.float32) * 0.1

    # conv1d_block (BN folded); w1 rows zero-padded to the lane-aligned K
    w1, b1 = conv_bn_params(ks[4], DIM_FUSE, 512)
    w1 = jnp.pad(w1, ((0, DIM_FUSE_PAD - DIM_FUSE), (0, 0)))
    w2, b2 = conv_bn_params(ks[5], 512, 512)
    w3, b3 = conv_bn_params(ks[6], 512, 256)

    # recon_head
    wr1, br1 = conv_bn_params(ks[7], 256, 128)
    wr2, br2 = conv_params(ks[8], 128, RECON_NUM)

    # face_head (first conv cin = FEAT_FACE + 3 = C_PF + 256 + 3); split rows
    wf1, bf1 = conv_bn_params(ks[9], FEAT_FACE + 3, 512)
    wf1a = wf1[:C_PF]                      # folded into the bias at forward time
    wf1b = wf1[C_PF:C_PF + 256]
    wf1c = wf1[C_PF + 256:]                # (3, 512), applied on the VPU
    wf2, bf2 = conv_bn_params(ks[10], 512, 256)
    wf3, bf3 = conv_bn_params(ks[11], 256, 128)
    wf4, bf4 = conv_params(ks[12], 128, FACE_RECON_C)

    # lane-dense combined output projection: recon -> cols [0,3), face -> [3,33)
    wout_r = jnp.zeros((128, OUT_PAD), jnp.float32).at[:, :RECON_NUM].set(wr2)
    wout_f = jnp.zeros((128, OUT_PAD), jnp.float32).at[
        :, RECON_NUM:RECON_NUM + FACE_RECON_C].set(wf4)
    bout = jnp.zeros((1, OUT_PAD), jnp.float32)
    bout = bout.at[:, :RECON_NUM].set(br2)
    bout = bout.at[:, RECON_NUM:RECON_NUM + FACE_RECON_C].set(bf4)

    p["wf1a"] = wf1a          # f32, used to fold f_global into the face bias
    p["bf1"] = bf1
    p["head_consts"] = dict(
        w1=w1.astype(bf16), b1=b1,
        w2=w2.astype(bf16), b2=b2,
        w3=w3.astype(bf16), b3=b3,
        wr1=wr1.astype(bf16), br1=br1,
        wf1b=wf1b.astype(bf16), wf1c=wf1c,
        wf2=wf2.astype(bf16), bf2=bf2,
        wf3=wf3.astype(bf16), bf3=bf3,
        wout_r=wout_r.astype(bf16), wout_f=wout_f.astype(bf16), bout=bout,
    )
    return p


# ---------------------------------------------------------------------------
# FaceRecon.forward
# ---------------------------------------------------------------------------
def face_recon_forward(vertices, cat_id, params):
    # vertices: (bs, N, 3); the module's unsqueeze(0) logic implies bs == 1.
    del cat_id  # unused in the reference forward
    bs, n, _ = vertices.shape
    assert bs == 1 and n % TN == 0, "pad the point count to a multiple of TN"
    verts = vertices[0].astype(jnp.float32)                       # (N, 3)

    # TODO(synk): self.ptv2 (PointTransformerV2Network) is an external backbone;
    # stubbed here with a deterministic linear+tanh projection of the coords.
    global_point_feat = jnp.tanh(verts @ params["ptv2_wg"] + params["ptv2_bg"])  # (N, dim_fuse)
    point_feat = jnp.tanh(verts @ params["ptv2_wp"] + params["ptv2_bp"])         # (N, C_PF)

    f_global = global_max(point_feat)                             # (1, C_PF)

    # fold the (constant across tiles) f_global contribution of the face-head
    # first conv into its bias: tiny matmul, done once outside the kernel.
    bf1_eff = f_global @ params["wf1a"] + params["bf1"]           # (1, 512)

    hc = params["head_consts"]
    ops = [hc["w1"], hc["b1"], hc["w2"], hc["b2"], hc["w3"], hc["b3"],
           hc["wr1"], hc["br1"],
           hc["wf1b"], hc["wf1c"], bf1_eff,
           hc["wf2"], hc["bf2"], hc["wf3"], hc["bf3"],
           hc["wout_r"], hc["wout_f"], hc["bout"]]

    feat_pad = jnp.pad(
        global_point_feat, ((0, 0), (0, DIM_FUSE_PAD - DIM_FUSE))
    ).astype(jnp.bfloat16)

    out = run_heads(feat_pad, verts, ops)                         # (N, OUT_PAD)
    recon = out[:, :RECON_NUM]
    face = out[:, RECON_NUM:RECON_NUM + FACE_RECON_C]

    # match torch return: recon.permute(0,2,1), face.permute(0,2,1), feat
    return recon[None], face[None], global_point_feat[None]


if __name__ == "__main__":
    key = jax.random.PRNGKey(0)
    k_pts, k_par = jax.random.split(key)

    N = 512
    vertices = jax.random.normal(k_pts, (1, N, 3), jnp.float32)
    cat_id = jnp.zeros((1, 1), jnp.int32)
    params = build_params(k_par)

    recon, face, feat = face_recon_forward(vertices, cat_id, params)
    jax.block_until_ready((recon, face, feat))

    assert recon.shape == (1, N, RECON_NUM)
    assert face.shape == (1, N, FACE_RECON_C)
    assert feat.shape == (1, N, DIM_FUSE)
    print("KERNEL_OK")
</pallas_src>

<mosaic_0001>
module attributes {stable_mosaic.version = 11 : i64} {
  func.func @max_reduce_kernel(%arg0: i32, %arg1: memref<256x128xf32, #tpu.memory_space<vmem>>, %arg2: memref<1x128xf32, #tpu.memory_space<vmem>>, %arg3: memref<1x128xf32, #tpu.memory_space<vmem>>) attributes {dimension_semantics = [#tpu.dimension_semantics<arbitrary>], iteration_bounds = array<i64: 2>, scalar_prefetch = 0 : i64, scratch_operands = 1 : i64, tpu.core_type = #tpu.core_type<tc>, window_params = [{transform_indices = @transform_0, window_bounds = array<i64: 256, 128>}, {pipeline_mode = #tpu.pipeline_mode<synchronous>, transform_indices = @transform_1, window_bounds = array<i64: 1, 128>}]} {
    %c0 = arith.constant 0 : index
    %c0_0 = arith.constant 0 : index
    %0 = vector.load %arg1[%c0, %c0_0] : memref<256x128xf32, #tpu.memory_space<vmem>>, vector<256x128xf32>
    %cst = arith.constant dense<0xFF800000> : vector<128xf32>
    %1 = vector.multi_reduction <maximumf>, %0, %cst [0] : vector<256x128xf32> to vector<128xf32>
    %2 = vector.shape_cast %1 : vector<128xf32> to vector<1x128xf32>
    %c0_i32 = arith.constant 0 : i32
    %3 = arith.cmpi eq, %arg0, %c0_i32 : i32
    %4 = arith.extui %3 : i1 to i32
    %c0_i32_1 = arith.constant 0 : i32
    %5 = arith.cmpi ne, %4, %c0_i32_1 : i32
    scf.if %5 {
      %c0_5 = arith.constant 0 : index
      %c0_6 = arith.constant 0 : index
      %12 = vector.load %arg3[%c0_5, %c0_6] : memref<1x128xf32, #tpu.memory_space<vmem>>, vector<1x128xf32>
      tpu.vector_store %arg3[%c0_5, %c0_6], %2 {strides = array<i32>} : memref<1x128xf32, #tpu.memory_space<vmem>>, vector<1x128xf32>,
    } else {
    }
    %c0_i32_2 = arith.constant 0 : i32
    %6 = arith.cmpi sgt, %arg0, %c0_i32_2 : i32
    %7 = arith.extui %6 : i1 to i32
    %c0_i32_3 = arith.constant 0 : i32
    %8 = arith.cmpi ne, %7, %c0_i32_3 : i32
    scf.if %8 {
      %c0_5 = arith.constant 0 : index
      %c0_6 = arith.constant 0 : index
      %12 = vector.load %arg3[%c0_5, %c0_6] : memref<1x128xf32, #tpu.memory_space<vmem>>, vector<1x128xf32>
      %13 = arith.maximumf %12, %2 : vector<1x128xf32>
      %c0_7 = arith.constant 0 : index
      %c0_8 = arith.constant 0 : index
      %14 = vector.load %arg3[%c0_7, %c0_8] : memref<1x128xf32, #tpu.memory_space<vmem>>, vector<1x128xf32>
      tpu.vector_store %arg3[%c0_7, %c0_8], %13 {strides = array<i32>} : memref<1x128xf32, #tpu.memory_space<vmem>>, vector<1x128xf32>,
    } else {
    }
    %c1_i32 = arith.constant 1 : i32
    %9 = arith.cmpi eq, %arg0, %c1_i32 : i32
    %10 = arith.extui %9 : i1 to i32
    %c0_i32_4 = arith.constant 0 : i32
    %11 = arith.cmpi ne, %10, %c0_i32_4 : i32
    scf.if %11 {
      %c0_5 = arith.constant 0 : index
      %c0_6 = arith.constant 0 : index
      %12 = vector.load %arg3[%c0_5, %c0_6] : memref<1x128xf32, #tpu.memory_space<vmem>>, vector<1x128xf32>
      %c0_7 = arith.constant 0 : index
      %c0_8 = arith.constant 0 : index
      %13 = vector.load %arg2[%c0_7, %c0_8] : memref<1x128xf32, #tpu.memory_space<vmem>>, vector<1x128xf32>
      tpu.vector_store %arg2[%c0_7, %c0_8], %12 {strides = array<i32>} : memref<1x128xf32, #tpu.memory_space<vmem>>, vector<1x128xf32>,
    } else {
    }
    return
  }
  func.func @transform_0(%arg0: i32) -> (i32, i32) {
    %c0_i32 = arith.constant 0 : i32
    %c0_i32_0 = arith.constant 0 : i32
    return %arg0, %c0_i32 : i32, i32
  }
  func.func @transform_1(%arg0: i32) -> (i32, i32) {
    %c0_i32 = arith.constant 0 : i32
    %c0_i32_0 = arith.constant 0 : i32
    %c0_i32_1 = arith.constant 0 : i32
    return %c0_i32, %c0_i32_0 : i32, i32
  }
}

</mosaic_0001>

<bundles_post_ra>
// kernel: tpu_custom_call.1
= control target key start
LH: loop header
LB: loop body
LE: loop exit
PB: predicated region body
PF: predicated region fallthrough
CT: control target
= control target key end

     0   :  { %6 = vsyncpa [#allocation4], 0  ;;  %s605_s0 = inlined_call_operand.hbm [shape: f32[512,128], index: 0, kind: input, shape index: {}]   ;;  %s606_s1 = inlined_call_operand.hbm [shape: f32[1,128], index: 1, kind: output, shape index: {}]  }
   0x1   :  { %8 = vsyncpa [#allocation4 + $0x1], 0 }
   0x2   :  { %9 = vsyncpa [#allocation5], 0  ;;  %s442_s6 = smov 0   ;;  %s444_s7 = smov 0  }
   0x3   :  { %s446_s8 = smov 0   ;;  %s448_s9 = smov 0  }
   0x4 LB: > { %s461_s10 = sadd.s32 4294967295, %s426_s9   ;;  %s464_s11 = sadd.s32 1, %s426_s9   ;;  %s426_s9 = sphi %s448_s9, %s613_s9   ;;  %s422_s8 = sphi %s446_s8, %s612_s8   ;;  %s418_s7 = sphi %s444_s7, %s611_s7   ;;  %s414_s6 = sphi %s442_s6, %s610_s6  }
   0x5   : > { %s19_s12 = ssub.s32 %s426_s9, %s464_s11  ;;  %s22_s13 = sadd.s32 1, %s422_s8 }
   0x6   : > { %p20_p0 = scmp.eq.s32.totalorder %s19_s12, 0  ;;  %p29_p1 = scmp.ne.s32.totalorder %s422_s8, %s418_s7 }
   0x7   : > { %p30_p2 = scmp.eq.s32.totalorder %s426_s9, 0  ;;  %p35_p3 = scmp.ne.s32.totalorder %s418_s7, %s414_s6 }
   0x8   : > { %s474_s14 = scalar_select %p20_p0, %s422_s8, %s22_s13  }
   0x9   : > { %p31_p4 = por %p30_p2, %p29_p1  ;;  %p36_p5 = scmp.eq.s32.totalorder %s461_s10, 0 }
   0xa   : > { %p294_p6 = scmp.lt.s32.totalorder %s426_s9, 2  ;;  %s80_s16 = sand.u32 1, %s422_s8  }
   0xb   : > { %p478_p7 = por %p36_p5, %p35_p3  ;;  %s271_s17 = sshll.u32 %s80_s16, 8 }
   0xc   : > { %s283_s18 = sshll.u32 %s426_s9, 12  ;;  %s84_s22 = scalar_lea.vmem [#allocation3], %s271_s17 }
   0xd   : > { %s487_s21 = scalar_lea.hbm %s605_s0, %s283_s18  ;;  %s91_s23 = sshll.u32 %s84_s22, 4  ;;  %s489_s23 = int_to_ptr.vmem [resolvable:$true] %s91_s23 }
   0xe   : > { %p491_p8 = pnand %p294_p6, %p31_p4  ;;  %s496_s25 = scalar_lea.sflag [#allocation4], %s80_s16 }
   0xf   : > { %s332_s26 = scalar_lea.hbm %s487_s21, 4096  ;;  %s337_s29 = scalar_lea.hbm %s605_s0, 8192 }
  0x10   : > { %p333_p10 = scmp.ne.s32.totalorder %s487_s21, %s332_s26  ;;  %p334_p11 = pneg %p491_p8 }
  0x11   : > { %p338_p0 = scmp.lt.u32.totalorder %s487_s21, %s605_s0  ;;  %p339_p1 = scmp.lt.u32.totalorder %s337_s29, %s332_s26 }
  0x12   : > { %p335_p12 = pnand %p334_p11, %p333_p10  ;;  %p341_p3 = scmp.lt.u32.totalorder %s332_s26, %s487_s21 }
  0x13   : > { %p340_p2 = por %p339_p1, %p338_p0 }
  0x14   : > { %p336_p13 = pneg %p335_p12 }
  0x15   : > { %p342_p4 = por %p341_p3, %p340_p2 }
  0x17   : > { %p343_p5 = pnand %p342_p4, %p336_p13 }
  0x19   : > { %346 = shalt.err (!%p343_p5)
}
  0x1a   : > { %s347_s3 = scalar_lea.vmem %s489_s23, 4096  ;;  %s428_s4 = smov [#allocation3]  }
  0x1b   : > { %p348_p6 = scmp.ne.s32.totalorder %s489_s23, %s347_s3  ;;  %s352_s5 = sshll.u32 %s428_s4, 4  ;;  %s353_s5 = int_to_ptr.vmem [resolvable:$false] %s352_s5 }
  0x1c   : > { %s354_s6 = scalar_lea.vmem %s353_s5, 8192  ;;  %p355_p9 = scmp.lt.s32.totalorder %s489_s23, %s353_s5 }
  0x1d   : > { %p350_p10 = pnand %p348_p6, %p334_p11  ;;  %p356_p0 = scmp.lt.s32.totalorder %s354_s6, %s347_s3 }
  0x1f   : > { %p351_p12 = pneg %p350_p10  ;;  %p357_p1 = por %p356_p0, %p355_p9 }
  0x21   : > { %p358_p2 = pnand %p357_p1, %p351_p12 }
  0x23   : > { %361 = shalt.err (!%p358_p2)
}
  0x24   : > { %s429_s12 = smov 128   ;;  %s430_s13 = smov 8  }
  0x25   : > { %293 = dma.hbm_to_vmem [thread:$0]  (!%p491_p8), %s487_s21, 4096, %s489_s23, %s496_s25, %s429_s12, %s429_s12, %s430_s13  }
  0x26   : > { %p99_p11 = scmp.lt.s32.totalorder %s426_s9, 3  ;;  %p609_p13 = scmp.ge.s32.totalorder %s426_s9, 1 }
  0x28   : > { %p100_p3 = pnand %p609_p13, %p99_p11 }
  0x29   : > { %s105_s16 = sand.u32 (!%p100_p3), 1, %s418_s7  }
  0x2a   : > { %103 = sbr.rel (%p100_p3) target bundleno = 128 (0x80), region = 24  ;;  %s275_s17 = sshll.u32 (!%p100_p3), %s105_s16, 8 }
  0x2b   : > { %s106_s18 = scalar_lea.sflag (!%p100_p3), [#allocation4], %s105_s16  ;;  %s528_s19 = scalar_lea.vmem (!%p100_p3), [#allocation3], %s275_s17 }
  0x31   : > { %405 = dma.done.wait (%p478_p7), %s106_s18, 4096  }
  0x32   : > { %407 = vsyncadd (%p478_p7), %s106_s18, 4294963200  ;;  %v124_v0 = vld [vmem:[%s528_s19] sm:$0xff]  ;;  %v125_v1 = vld [vmem:[%s528_s19 + $0x8] sm:$0xff]  ;;  %p276_p7 = scmp.ne.s32.totalorder %s461_s10, 0 }
  0x33   : > { %v126_v2 = vld [vmem:[%s528_s19 + $0x10] sm:$0xff]  ;;  %v127_v3 = vld [vmem:[%s528_s19 + $0x18] sm:$0xff]  ;;  %v128_v4 = vld [vmem:[%s528_s19 + $0x20] sm:$0xff] }
  0x34   : > { %v129_v5 = vld [vmem:[%s528_s19 + $0x28] sm:$0xff]  ;;  %v130_v6 = vld [vmem:[%s528_s19 + $0x30] sm:$0xff]  ;;  %v131_v7 = vld [vmem:[%s528_s19 + $0x38] sm:$0xff]  ;;  %v156_v9 = vmax.f32 %v124_v0, %v128_v4 }
  0x35   : > { %v132_v8 = vld [vmem:[%s528_s19 + $0x40] sm:$0xff]  ;;  %v157_v10 = vmax.f32 %v125_v1, %v129_v5  ;;  %v133_v11 = vld [vmem:[%s528_s19 + $0x48] sm:$0xff]  ;;  %v134_v12 = vld [vmem:[%s528_s19 + $0x50] sm:$0xff]  ;;  %v158_v14 = vmax.f32 %v126_v2, %v130_v6  ;;  %v159_v15 = vmax.f32 %v127_v3, %v131_v7 }
  0x36   : > { %v135_v13 = vld [vmem:[%s528_s19 + $0x58] sm:$0xff]  ;;  %v136_v16 = vld [vmem:[%s528_s19 + $0x60] sm:$0xff]  ;;  %v137_v17 = vld [vmem:[%s528_s19 + $0x68] sm:$0xff]  ;;  %v160_v19 = vmax.f32 %v156_v9, %v132_v8 }
  0x37   : > { %v138_v18 = vld [vmem:[%s528_s19 + $0x70] sm:$0xff]  ;;  %v161_v20 = vmax.f32 %v157_v10, %v133_v11  ;;  %v139_v21 = vld [vmem:[%s528_s19 + $0x78] sm:$0xff]  ;;  %v140_v22 = vld [vmem:[%s528_s19 + $0x80] sm:$0xff]  ;;  %v162_v24 = vmax.f32 %v158_v14, %v134_v12  ;;  %v163_v25 = vmax.f32 %v159_v15, %v135_v13 }
  0x38   : > { %v141_v23 = vld [vmem:[%s528_s19 + $0x88] sm:$0xff]  ;;  %v142_v26 = vld [vmem:[%s528_s19 + $0x90] sm:$0xff]  ;;  %v143_v27 = vld [vmem:[%s528_s19 + $0x98] sm:$0xff]  ;;  %v164_v28 = vmax.f32 %v160_v19, %v136_v16 }
  0x39   : > { %v165_v29 = vmax.f32 %v161_v20, %v137_v17  ;;  %v144_v30 = vld [vmem:[%s528_s19 + $0xa0] sm:$0xff]  ;;  %v145_v31 = vld [vmem:[%s528_s19 + $0xa8] sm:$0xff]  ;;  %v166_v32 = vmax.f32 %v162_v24, %v138_v18  ;;  %v167_v33 = vmax.f32 %v163_v25, %v139_v21  ;;  %v146_v34 = vld [vmem:[%s528_s19 + $0xb0] sm:$0xff] }
  0x3a   : > { %v147_v35 = vld [vmem:[%s528_s19 + $0xb8] sm:$0xff]  ;;  %v168_v36 = vmax.f32 %v164_v28, %v140_v22  ;;  %v148_v38 = vld [vmem:[%s528_s19 + $0xc0] sm:$0xff]  ;;  %v149_v39 = vld [vmem:[%s528_s19 + $0xc8] sm:$0xff] }
  0x3b   : > { %v169_v37 = vmax.f32 %v165_v29, %v141_v23  ;;  %v170_v40 = vmax.f32 %v166_v32, %v142_v26  ;;  %v171_v41 = vmax.f32 %v167_v33, %v143_v27  ;;  %v150_v42 = vld [vmem:[%s528_s19 + $0xd0] sm:$0xff]  ;;  %v151_v43 = vld [vmem:[%s528_s19 + $0xd8] sm:$0xff]  ;;  %v152_v46 = vld [vmem:[%s528_s19 + $0xe0] sm:$0xff] }
  0x3c   : > { %v172_v44 = vmax.f32 %v168_v36, %v144_v30  ;;  %v153_v47 = vld [vmem:[%s528_s19 + $0xe8] sm:$0xff]  ;;  %v154_v50 = vld [vmem:[%s528_s19 + $0xf0] sm:$0xff]  ;;  %v155_v51 = vld [vmem:[%s528_s19 + $0xf8] sm:$0xff] }
  0x3d   : > { %v173_v45 = vmax.f32 %v169_v37, %v145_v31  ;;  %v174_v48 = vmax.f32 %v170_v40, %v146_v34  ;;  %v175_v49 = vmax.f32 %v171_v41, %v147_v35 }
  0x3e   : > { %v176_v52 = vmax.f32 %v172_v44, %v148_v38 }
  0x3f   : > { %v177_v53 = vmax.f32 %v173_v45, %v149_v39  ;;  %v178_v54 = vmax.f32 %v174_v48, %v150_v42  ;;  %v179_v55 = vmax.f32 %v175_v49, %v151_v43 }
  0x40   : > { %v180_v56 = vmax.f32 %v176_v52, %v152_v46 }
  0x41   : > { %v181_v57 = vmax.f32 %v177_v53, %v153_v47  ;;  %v182_v58 = vmax.f32 %v178_v54, %v154_v50  ;;  %v183_v59 = vmax.f32 %v179_v55, %v155_v51 }
  0x43   : > { %v184_v60 = vmax.f32 %v180_v56, %v181_v57  ;;  %v185_v61 = vmax.f32 %v182_v58, %v183_v59 }
  0x45   : > { %v186_v62 = vmax.f32 %v184_v60, %v185_v61 }
  0x47   : > { %v187_v63 = vrot.slane %v186_v62, 4 }
  0x49   : > { %v188_v0 = vmax.f32 %v186_v62, %v187_v63 }
  0x4b   : > { %v189_v1 = vrot.slane %v188_v0, 2  ;;  %196 = sbr.rel (%p276_p7) target bundleno = 84 (0x54), region = 32 }
  0x4d   : > { %v190_v2 = vmax.f32 %v188_v0, %v189_v1 }
  0x4f   : > { %v191_v3 = vrot.slane %v190_v2, 1 }
  0x51   : > { %v192_v4 = vmax.f32 %v190_v2, %v191_v3 }
  0x53   : > { %197 = vst [vmem:[#allocation2] sm:$0x1] %v192_v4 }
  0x54 PF: > { %p277_p8 = scmp.le.s32.totalorder %s461_s10, 0 }
  0x56   : > { %201 = sbr.rel (%p277_p8) target bundleno = 94 (0x5e), region = 36 }
  0x5a   : > { %v202_v5 = vld [vmem:[#allocation2] sm:$0x1] (!%p277_p8) }
  0x5b   : > { %v203_v6 = vmax.f32 (!%p277_p8), %v202_v5, %v192_v4 }
  0x5d   : > { %204 = vst [vmem:[#allocation2] sm:$0x1] %v203_v6 }
  0x5e PF: > { %p278_p9 = scmp.ne.s32.totalorder %s461_s10, 1 }
  0x60   : > { %208 = sbr.rel (%p278_p9) target bundleno = 103 (0x67), region = 40 }
  0x64   : > { %v209_v7 = vld [vmem:[#allocation2] sm:$0x1] (!%p278_p9) }
  0x65   : > { %210 = vst [vmem:[#allocation6] sm:$0x1] (!%p278_p9), %v209_v7 }
  0x67 PF: > { %p295_p4 = scmp.eq.s32.totalorder %s461_s10, 1  ;;  %s431_s9 = smov [#allocation6]  }
  0x68   : > { %s218_s15 = sshll.u32 %s431_s9, 4  ;;  %s219_s15 = int_to_ptr.vmem [resolvable:$true] %s218_s15 }
  0x69   : > { %s362_s20 = scalar_lea.vmem %s219_s15, 16  ;;  %s368_s21 = scalar_lea.vmem %s219_s15, 32 }
  0x6a   : > { %p363_p5 = scmp.ne.s32.totalorder %s219_s15, %s362_s20  ;;  %p369_p12 = scmp.lt.s32.totalorder %s219_s15, %s219_s15 }
  0x6b   : > { %p370_p0 = scmp.lt.s32.totalorder %s368_s21, %s362_s20 }
  0x6c   : > { %p364_p6 = pnand %p363_p5, %p295_p4 }
  0x6d   : > { %p371_p1 = por %p370_p0, %p369_p12 }
  0x6e   : > { %p365_p10 = pneg %p364_p6 }
  0x70   : > { %p372_p2 = pnand %p371_p1, %p365_p10 }
  0x72   : > { %375 = shalt.err (!%p372_p2)
}
  0x73   : > { %s376_s24 = scalar_lea.hbm %s606_s1, 16 }
  0x74   : > { %p377_p11 = scmp.ne.s32.totalorder %s606_s1, %s376_s24  ;;  %p382_p7 = scmp.lt.u32.totalorder %s376_s24, %s606_s1 }
  0x76   : > { %p378_p13 = pnand %p377_p11, %p295_p4 }
  0x78   : > { %p379_p3 = pneg %p378_p13 }
  0x7a   : > { %p384_p8 = pnand %p382_p7, %p379_p3 }
  0x7c   : > { %387 = shalt.err (!%p384_p8)
}
  0x7d   : > { %287 = dma.vmem_to_hbm [thread:$0]  (%p295_p4), %s219_s15, 16, %s606_s1, [#allocation5]  }
  0x7e   : > { %409 = dma.done.wait (%p295_p4), [#allocation5], 16  }
  0x7f   : > { %411 = vsyncadd (%p295_p4), [#allocation5], 4294967280 }
  0x80 PF: > { %p12_p9 = scmp.ge.s32.totalorder %s464_s11, 4   ;;  %s610_s6 = smov %s418_s7 }
  0x81   : > { %s611_s7 = smov %s422_s8  ;;  %s612_s8 = smov %s474_s14 }
  0x82   : > { %s613_s9 = smov %s464_s11  ;;  %14 = sbr.rel (!%p12_p9) target bundleno = 4 (0x4), region = 73 }
  0x89   :  { %231 = vsyncpa [#allocation4], 1 }
  0x8a   :  { %233 = vsyncpa [#allocation4 + $0x1], 1 }
  0x8b   :  { %234 = vsyncpa [#allocation5], 1 }
  0x8c   :  { %236 = vsyncpa [#allocation5 + $0x1], 1 }

</bundles_post_ra>
